<compile_context>
chip_gen: v7x
topology: tpu7x:2x2x1
jax: 0.10.0
libtpu: 0.0.40
codegen_flags: <defaults>
</compile_context>

<pallas_src>
import jax
import jax.numpy as jnp
from jax import lax
from jax.experimental import pallas as pl
from jax.experimental.pallas import tpu as pltpu


def _cdiv(a, b):
    return -(-a // b)


def _round_up_128(v):
    return max(128, _cdiv(v, 128) * 128)


def _disparity_regression_kernel(x_ref, o_ref):
    # x_ref: (nb, D, T)  probability-volume block, native dtype
    # o_ref: (nb, 1, T)  f32 expected disparity per spatial point
    D = x_ref.shape[1]
    x = x_ref[...].astype(jnp.float32)                 # upcast under the DMA
    # Tiny disparity ramp 0..D-1 along the reduction axis; lane/batch broadcast
    # happens in the multiply (no full (D, T) iota materialized per step).
    disp = lax.broadcasted_iota(jnp.int32, (1, D, 1), 1).astype(jnp.float32)
    o_ref[...] = jnp.sum(x * disp, axis=1, keepdims=True)


def _plan_tiles(N, D, HW, itemsize, target_bytes):
    """Pick (nb, t) so each grid step moves ~target_bytes and >=2 steps exist."""
    # Lane-dense spatial tile: multiple of 128, or the whole HW if it fits.
    row_bytes = D * itemsize
    t_cap = max(128, (target_bytes // row_bytes) // 128 * 128)
    t = HW if HW <= t_cap else t_cap
    n_tiles = _cdiv(HW, t)

    # Shallow volumes (small D / small HW): widen over batch to keep the
    # per-step DMA near the target size.
    nb = 1
    if N > 1 and n_tiles == 1:
        blk = D * t * itemsize
        nb = int(min(N, max(1, target_bytes // max(blk, 1))))
    n_bsteps = _cdiv(N, nb)

    # v7x has 2 TensorCores per chip: make sure the parallel grid has >= 2
    # steps so both cores get work (v5e/v6e are unaffected).
    if n_bsteps * n_tiles < 2:
        if nb > 1:
            nb = max(1, nb // 2)
            n_bsteps = _cdiv(N, nb)
        if n_bsteps * n_tiles < 2 and HW > 128:
            t = _round_up_128(_cdiv(HW, 2))
            n_tiles = _cdiv(HW, t)

    return nb, t, n_bsteps, n_tiles


def disparity_regression(x, *, target_block_bytes=4 << 20):
    """Pallas forward of `disparityregression`.

    Args:
      x: (N, maxdisp, H, W) probability volume (any float dtype; typically the
         softmax over dim 1).
    Returns:
      (N, H, W) float32 expected disparity.
    """
    N, D, H, W = x.shape
    HW = H * W
    itemsize = jnp.dtype(x.dtype).itemsize
    x_flat = x.reshape(N, D, HW)          # native dtype: no HBM-doubling pre-cast

    nb, t, n_bsteps, n_tiles = _plan_tiles(N, D, HW, itemsize, target_block_bytes)

    # Double-buffered input + output blocks, plus a little headroom; clamp to
    # stay under v7x's 64 MiB physical VMEM per TensorCore.
    in_block_bytes = nb * D * t * itemsize
    out_block_bytes = nb * 1 * t * 4
    vmem_limit = int(min(64 << 20,
                         max(16 << 20,
                             2 * (in_block_bytes + out_block_bytes) + (2 << 20))))

    out = pl.pallas_call(
        _disparity_regression_kernel,
        out_shape=jax.ShapeDtypeStruct((N, 1, HW), jnp.float32),
        grid=(n_bsteps, n_tiles),
        in_specs=[pl.BlockSpec((nb, D, t), lambda n, i: (n, 0, i))],
        out_specs=pl.BlockSpec((nb, 1, t), lambda n, i: (n, 0, i)),
        compiler_params=pltpu.CompilerParams(
            dimension_semantics=("parallel", "parallel"),
            vmem_limit_bytes=vmem_limit),
    )(x_flat)

    return out.reshape(N, H, W)


def _reference(x):
    """Pure-JAX reference matching the PyTorch module (f32 accumulation)."""
    D = x.shape[1]
    disp = jnp.arange(D, dtype=jnp.float32).reshape(1, D, 1, 1)
    return jnp.sum(x.astype(jnp.float32) * disp, axis=1)


if __name__ == "__main__":
    key = jax.random.PRNGKey(0)

    # Small shapes consistent with the module: x is a (N, maxdisp, H, W) volume.
    N, maxdisp, H, W = 2, 16, 16, 16
    logits = jax.random.normal(key, (N, maxdisp, H, W), jnp.float32)
    x = jax.nn.softmax(logits, axis=1)      # typical disparityregression input

    # f32 path.
    out = jax.block_until_ready(disparity_regression(x))
    ref = _reference(x)
    assert out.shape == ref.shape == (N, H, W), (out.shape, ref.shape)
    assert jnp.allclose(out, ref, atol=1e-4, rtol=1e-4), \
        float(jnp.max(jnp.abs(out - ref)))

    # bf16 path: fed in native dtype, upcast inside the kernel.
    x_bf16 = x.astype(jnp.bfloat16)
    out_bf = jax.block_until_ready(disparity_regression(x_bf16))
    ref_bf = _reference(x_bf16)
    assert out_bf.shape == (N, H, W)
    assert jnp.allclose(out_bf, ref_bf, atol=1e-3, rtol=1e-3), \
        float(jnp.max(jnp.abs(out_bf - ref_bf)))

    print("KERNEL_OK")
</pallas_src>

<mosaic_0001>
module attributes {stable_mosaic.version = 11 : i64} {
  func.func @_disparity_regression_kernel(%arg0: i32, %arg1: i32, %arg2: memref<1x16x256xf32, #tpu.memory_space<vmem>>, %arg3: memref<1x1x256xf32, #tpu.memory_space<vmem>>) attributes {dimension_semantics = [#tpu.dimension_semantics<parallel>, #tpu.dimension_semantics<parallel>], iteration_bounds = array<i64: 2, 1>, scalar_prefetch = 0 : i64, scratch_operands = 0 : i64, tpu.core_type = #tpu.core_type<tc>, window_params = [{transform_indices = @transform_0, window_bounds = array<i64: 1, 16, 256>}, {transform_indices = @transform_1, window_bounds = array<i64: 1, 1, 256>}]} {
    %c0 = arith.constant 0 : index
    %c0_0 = arith.constant 0 : index
    %c0_1 = arith.constant 0 : index
    %0 = vector.load %arg2[%c0, %c0_0, %c0_1] : memref<1x16x256xf32, #tpu.memory_space<vmem>>, vector<1x16x256xf32>
    %1 = tpu.iota {dimensions = array<i32: 1>} : vector<1x16x1xi32>
    %2 = arith.sitofp %1 : vector<1x16x1xi32> to vector<1x16x1xf32>
    %3 = vector.broadcast %2 : vector<1x16x1xf32> to vector<1x16x256xf32>
    %4 = arith.mulf %0, %3 : vector<1x16x256xf32>
    %cst = arith.constant dense<0.000000e+00> : vector<1x256xf32>
    %5 = vector.multi_reduction <add>, %4, %cst [1] : vector<1x16x256xf32> to vector<1x256xf32>
    %6 = vector.shape_cast %5 : vector<1x256xf32> to vector<1x1x256xf32>
    %c0_2 = arith.constant 0 : index
    %c0_3 = arith.constant 0 : index
    %c0_4 = arith.constant 0 : index
    %7 = vector.load %arg3[%c0_2, %c0_3, %c0_4] : memref<1x1x256xf32, #tpu.memory_space<vmem>>, vector<1x1x256xf32>
    tpu.vector_store %arg3[%c0_2, %c0_3, %c0_4], %6 {strides = array<i32>} : memref<1x1x256xf32, #tpu.memory_space<vmem>>, vector<1x1x256xf32>,
    return
  }
  func.func @transform_0(%arg0: i32, %arg1: i32) -> (i32, i32, i32) {
    %c0_i32 = arith.constant 0 : i32
    %c0_i32_0 = arith.constant 0 : i32
    return %arg0, %c0_i32, %arg1 : i32, i32, i32
  }
  func.func @transform_1(%arg0: i32, %arg1: i32) -> (i32, i32, i32) {
    %c0_i32 = arith.constant 0 : i32
    %c0_i32_0 = arith.constant 0 : i32
    return %arg0, %c0_i32, %arg1 : i32, i32, i32
  }
}

</mosaic_0001>

<bundles_post_ra>
// kernel: tpu_custom_call.1
= control target key start
LH: loop header
LB: loop body
LE: loop exit
PB: predicated region body
PF: predicated region fallthrough
CT: control target
= control target key end

     0   :  { %6 = vsyncpa [#allocation3], 0  ;;  %s691_s0 = inlined_call_operand.hbm [shape: f32[2,16,256], index: 0, kind: input, shape index: {}]   ;;  %s692_s1 = inlined_call_operand.hbm [shape: f32[2,1,256], index: 1, kind: output, shape index: {}]  }
   0x1   :  { %8 = vsyncpa [#allocation3 + $0x1], 0 }
   0x2   :  { %9 = vsyncpa [#allocation4], 0 }
   0x3   :  { %11 = vsyncpa [#allocation4 + $0x1], 0  ;;  %s517_s6 = smov 0   ;;  %s519_s7 = smov 0  }
   0x4   :  { %s521_s8 = smov 0   ;;  %s523_s9 = smov 0  }
   0x5   :  { %s525_s10 = smov 0   ;;  %s527_s11 = smov 0  }
   0x6 LB: > { %s306_s12 = sadd.s32 4294967295, %s500_s11   ;;  %s307_s13 = sadd.s32 4294967294, %s500_s11   ;;  %s500_s11 = sphi %s527_s11, %s17_s11   ;;  %s496_s10 = sphi %s525_s10, %s707_s10   ;;  %s492_s9 = sphi %s523_s9, %s706_s9   ;;  %s488_s8 = sphi %s521_s8, %s705_s8   ;;  %s484_s7 = sphi %s519_s7, %s704_s7   ;;  %s480_s6 = sphi %s517_s6, %s703_s6  }
   0x7   : > { %s29_s14 = sadd.s32 1, %s496_s10  ;;  %s38_s15 = sadd.s32 1, %s488_s8 }
   0x8   : > { %p31_p0 = scmp.ge.s32.totalorder %s29_s14, 2  ;;  %p45_p1 = scmp.ne.s32.totalorder %s488_s8, %s484_s7 }
   0x9   : > { %p46_p2 = scmp.eq.s32.totalorder %s500_s11, 0  ;;  %p51_p3 = scmp.ne.s32.totalorder %s484_s7, %s480_s6 }
   0xa   : > { %s709_s14 = smov (%p31_p0, %s29_s14), 0  ;;  %p52_p5 = scmp.eq.s32.totalorder %s306_s12, 0 }
   0xb   : > { %p558_p4 = por %p46_p2, %p45_p1  ;;  %s33_s17 = ssub.s32 %s496_s10, %s709_s14 }
   0xc   : > { %p77_p6 = scmp.eq.s32.totalorder %s306_s12, 1  ;;  %p36_p7 = scmp.eq.s32.totalorder %s33_s17, 0 }
   0xd   : > { %p564_p8 = por %p52_p5, %p51_p3  ;;  %p83_p10 = scmp.eq.s32.totalorder %s307_s13, 1 }
   0xe   : > { %p568_p9 = por %p77_p6, %p45_p1  ;;  %p335_p13 = scmp.lt.s32.totalorder %s500_s11, 2 }
   0xf   : > { %s573_s20 = scalar_select %p36_p7, %s488_s8, %s38_s15  }
  0x10   : > { %s696_s19 = scalar_select %p568_p9, 1, 0 }
  0x11   : > { %p575_p11 = por %p83_p10, %p51_p3  ;;  %s103_s22 = sand.u32 1, %s488_s8  }
  0x12   : > { %s310_s23 = sshll.u32 %s103_s22, 5  ;;  %s321_s24 = sshll.u32 %s496_s10, 9 }
  0x13   : > { %s697_s21 = scalar_select %p575_p11, 1, 0 }
  0x14   : > { %s586_s27 = scalar_lea.hbm %s691_s0, %s321_s24  ;;  %s107_s28 = scalar_lea.vmem [#allocation2], %s310_s23 }
  0x15   : > { %s116_s29 = sshll.u32 %s107_s28, 4  ;;  %p592_p0 = pnand %p335_p13, %p558_p4  ;;  %s588_s29 = int_to_ptr.vmem [resolvable:$true] %s116_s29 }
  0x16   : > { %s597_s2 = scalar_lea.sflag [#allocation3], %s103_s22  ;;  %s388_s3 = scalar_lea.hbm %s586_s27, 512 }
  0x17   : > { %p389_p2 = scmp.ne.s32.totalorder %s586_s27, %s388_s3  ;;  %p390_p3 = pneg %p592_p0 }
  0x18   : > { %s393_s12 = scalar_lea.hbm %s691_s0, 1024  ;;  %p394_p4 = scmp.lt.u32.totalorder %s586_s27, %s691_s0 }
  0x19   : > { %p391_p5 = pnand %p390_p3, %p389_p2  ;;  %p395_p7 = scmp.lt.u32.totalorder %s393_s12, %s388_s3 }
  0x1a   : > { %p397_p13 = scmp.lt.u32.totalorder %s388_s3, %s586_s27 }
  0x1b   : > { %p392_p6 = pneg %p391_p5  ;;  %p396_p10 = por %p395_p7, %p394_p4 }
  0x1d   : > { %p398_p12 = por %p397_p13, %p396_p10 }
  0x1f   : > { %p399_p1 = pnand %p398_p12, %p392_p6 }
  0x21   : > { %402 = shalt.err (!%p399_p1)
}
  0x22   : > { %s403_s16 = scalar_lea.vmem %s588_s29, 512  ;;  %s502_s17 = smov [#allocation2]  }
  0x23   : > { %p404_p2 = scmp.ne.s32.totalorder %s588_s29, %s403_s16  ;;  %s408_s22 = sshll.u32 %s502_s17, 4  ;;  %s409_s22 = int_to_ptr.vmem [resolvable:$false] %s408_s22 }
  0x24   : > { %s410_s23 = scalar_lea.vmem %s409_s22, 1024  ;;  %p411_p9 = scmp.lt.s32.totalorder %s588_s29, %s409_s22 }
  0x25   : > { %p406_p5 = pnand %p404_p2, %p390_p3  ;;  %p412_p4 = scmp.lt.s32.totalorder %s410_s23, %s403_s16 }
  0x27   : > { %p407_p11 = pneg %p406_p5  ;;  %p413_p7 = por %p412_p4, %p411_p9 }
  0x29   : > { %p414_p10 = pnand %p413_p7, %p407_p11 }
  0x2b   : > { %417 = shalt.err (!%p414_p10)
}
  0x2c   : > { %s503_s24 = smov 256   ;;  %s504_s25 = smov 16  }
  0x2d   : > { %330 = dma.hbm_to_vmem [thread:$0]  (!%p592_p0), %s586_s27, 512, %s588_s29, %s597_s2, %s503_s24, %s503_s24, %s504_s25  }
  0x2e   : > { %p124_p12 = scmp.lt.s32.totalorder %s500_s11, 3  ;;  %p699_p1 = scmp.ge.s32.totalorder %s500_s11, 1 }
  0x30   : > { %p125_p3 = pnand %p699_p1, %p124_p12 }
  0x31   : > { %s629_s26 = sand.u32 (!%p125_p3), 1, %s484_s7  }
  0x32   : > { %128 = sbr.rel (%p125_p3) target bundleno = 102 (0x66), region = 24  ;;  %s314_s28 = sshll.u32 (!%p125_p3), %s629_s26, 5 }
  0x33   : > { %s131_s3 = scalar_lea.sflag (!%p125_p3), [#allocation3], %s629_s26  ;;  %s134_s4 = scalar_lea.vmem (!%p125_p3), [#allocation2], %s314_s28 }
  0x39   : > { %471 = dma.done.wait (%p564_p8), %s131_s3, 512  }
  0x3a   : > { %473 = vsyncadd (%p564_p8), %s131_s3, 4294966784  ;;  %v159_v0 = vlaneseq  ;;  %v155_v5 = vld [vmem:[%s134_s4] sm:$0xff]  ;;  %v156_v6 = vld [vmem:[%s134_s4 + $0x8] sm:$0xff]  ;;  %v505_v19 = vmov 1966171168   ;;  %s315_s18 = sshll.u32 %s629_s26, 1 }
  0x3b   : > { %v157_v7 = vld [vmem:[%s134_s4 + $0x10] sm:$0xff]  ;;  %v158_v8 = vld [vmem:[%s134_s4 + $0x18] sm:$0xff]  ;;  %v186_v20 = vunpack.c.l.s4 %v505_v19  ;;  %s152_s27 = scalar_lea.vmem [#allocation5], %s315_s18  ;;  %s322_s30 = sshll.u32 %s492_s9, 5 }
  0x3c   : > { %v160_v1 = vshrl.u32 %v159_v0, 7  ;;  %s222_s29 = sshll.u32 %s152_s27, 4  ;;  %vm202_vm0 = vcmp.lt.s32.totalorder %v159_v0, 256  ;;  %s644_s12 = scalar_lea.hbm %s692_s1, %s322_s30  ;;  %s639_s29 = int_to_ptr.vmem [resolvable:$true] %s222_s29 }
  0x3d   : > { %v187_v25 = vunpack.c.0.s8 %v186_v20  ;;  %s206_s13 = scalar_lea.sflag [#allocation4], %s629_s26  ;;  %s418_s15 = scalar_lea.vmem %s639_s29, 32 }
  0x3e   : > { %v161_v2 = vadd.s32 8, %v160_v1  ;;  %v162_v3 = vcvt.s32.f32 %v160_v1  ;;  %p419_p8 = scmp.ne.s32.totalorder %s639_s29, %s418_s15  ;;  %p700_p9 = scmp.ne.s32.totalorder %s696_s19, 0 }
  0x3f   : > { %v190_v30 = vsub.s32 %v187_v25, %v160_v1  ;;  %s506_s9 = smov [#allocation5]  }
  0x40   : > { %v163_v4 = vcvt.s32.f32 %v161_v2  ;;  %v164_v9 = vmul.f32 %v162_v3, %v155_v5  ;;  %v165_v10 = vmul.f32 %v162_v3, %v156_v6  ;;  %p420_p11 = pnand %p419_p8, %p700_p9  ;;  %s422_s16 = sshll.u32 %s506_s9, 4  ;;  %s423_s16 = int_to_ptr.vmem [resolvable:$false] %s422_s16 }
  0x41   : > { %s424_s17 = scalar_lea.vmem %s423_s16, 64  ;;  %p425_p6 = scmp.lt.s32.totalorder %s639_s29, %s423_s16 }
  0x42   : > { %v166_v11 = vmul.f32 %v163_v4, %v157_v7  ;;  %v167_v12 = vmul.f32 %v163_v4, %v158_v8  ;;  %p421_p0 = pneg %p420_p11  ;;  %p426_p13 = scmp.lt.s32.totalorder %s424_s17, %s418_s15 }
  0x44   : > { %v168_v13 = vadd.f32 %v166_v11, %v164_v9  ;;  %v175_v14 = vadd.f32 %v167_v12, %v165_v10  ;;  %p427_p2 = por %p426_p13, %p425_p6 }
  0x46   : > { %v169_v15 = vrot.slane %v168_v13, 4  ;;  %v176_v16 = vrot.slane %v175_v14, 4  ;;  %p428_p5 = pnand %p427_p2, %p421_p0 }
  0x48   : > { %v170_v17 = vadd.f32 %v169_v15, %v168_v13  ;;  %v177_v18 = vadd.f32 %v176_v16, %v175_v14 }
  0x4a   : > { %v171_v21 = vrot.slane %v170_v17, 2  ;;  %v178_v22 = vrot.slane %v177_v18, 2 }
  0x4c   : > { %v172_v23 = vadd.f32 %v171_v21, %v170_v17  ;;  %v179_v24 = vadd.f32 %v178_v22, %v177_v18 }
  0x4e   : > { %v173_v26 = vrot.slane %v172_v23, 1  ;;  %v180_v27 = vrot.slane %v179_v24, 1 }
  0x50   : > { %v174_v28 = vadd.f32 %v173_v26, %v172_v23  ;;  %v181_v29 = vadd.f32 %v180_v27, %v179_v24 }
  0x52   : > { %v184_v31 = vcombine.low %v174_v28, %v181_v29 }
  0x54   : > { %v191_v32 = vrot.slane %v184_v31, %v190_v30 }
  0x56   : > { %v198_v33 = vrot.slane %v191_v32, %v190_v30 }
  0x58   : > { %204 = vst.msk [vmem:[%s152_s27] sm:$0x3] %vm202_vm0, %v198_v33 }
  0x59   : > { %431 = shalt.err (!%p428_p5)
}
  0x5a   : > { %s432_s22 = scalar_lea.hbm %s644_s12, 32  ;;  %s436_s25 = scalar_lea.hbm %s692_s1, 64 }
  0x5b   : > { %p433_p4 = scmp.ne.s32.totalorder %s644_s12, %s432_s22  ;;  %p437_p12 = scmp.lt.u32.totalorder %s644_s12, %s692_s1 }
  0x5c   : > { %p438_p1 = scmp.lt.u32.totalorder %s436_s25, %s432_s22  ;;  %p440_p8 = scmp.lt.u32.totalorder %s432_s22, %s644_s12 }
  0x5d   : > { %p434_p7 = pnand %p433_p4, %p700_p9 }
  0x5e   : > { %p439_p3 = por %p438_p1, %p437_p12 }
  0x5f   : > { %p435_p10 = pneg %p434_p7 }
  0x60   : > { %p441_p11 = por %p440_p8, %p439_p3 }
  0x62   : > { %p442_p0 = pnand %p441_p11, %p435_p10 }
  0x64   : > { %445 = shalt.err (!%p442_p0)
}
  0x65   : > { %325 = dma.vmem_to_hbm [thread:$0]  (%p700_p9), %s639_s29, 32, %s644_s12, %s206_s13  }
  0x66 PF: > { %s234_s3 = sand.u32 1, %s480_s6   ;;  %p701_p6 = scmp.ne.s32.totalorder %s697_s21, 0 }
  0x67   : > { %p702_p13 = scmp.ge.s32.totalorder %s500_s11, 2  ;;  %s235_s4 = scalar_lea.sflag [#allocation4], %s234_s3 }
  0x69   : > { %p332_p2 = pnand %p702_p13, %p701_p6 }
  0x6b   : > { %475 = dma.done.wait (!%p332_p2), %s235_s4, 32  }
  0x6c   : > { %477 = vsyncadd (!%p332_p2), %s235_s4, 4294967264  ;;  %s17_s11 = sadd.s32 1, %s500_s11   ;;  %s703_s6 = smov %s484_s7 }
  0x6d   : > { %p14_p5 = scmp.ge.s32.totalorder %s17_s11, 4   ;;  %s704_s7 = smov %s488_s8 }
  0x6e   : > { %s705_s8 = smov %s573_s20  ;;  %s706_s9 = smov %s496_s10 }
  0x6f   : > { %s707_s10 = smov %s709_s14  ;;  %16 = sbr.rel (!%p14_p5) target bundleno = 6 (0x6), region = 69 }
  0x76   :  { %240 = vsyncpa [#allocation3], 1 }
  0x77   :  { %242 = vsyncpa [#allocation3 + $0x1], 1 }
  0x78   :  { %243 = vsyncpa [#allocation4], 1 }
  0x79   :  { %245 = vsyncpa [#allocation4 + $0x1], 1 }

</bundles_post_ra>
